<compile_context>
chip_gen: v6e
topology: v6e:2x2x1
jax: 0.10.0
libtpu: 0.0.40
codegen_flags: <defaults>
</compile_context>

<pallas_src>
import jax
import jax.numpy as jnp
from jax import lax
from jax.experimental import pallas as pl
from jax.experimental.pallas import tpu as pltpu


def _round_up(v, m):
    return (v + m - 1) // m * m


def _pick_tb(B, HW, target_lanes=2048):
    """Images per grid step: fill ~target_lanes lanes but keep >= 2 grid steps."""
    cap = max(1, min(B // 2 if B >= 2 else B, max(1, target_lanes // HW)))
    for tb in range(min(cap, B), 0, -1):
        if B % tb == 0:
            return tb
    return 1


def _make_kernel(H, W, C_in, C_out, TB, has_proj):
    HW = H * W
    N = TB * HW          # matmul N dimension: batch folded onto lanes
    P = W + 1            # prefix so every 3x3 tap slice start is >= 0

    def kernel(*refs):
        if has_proj:
            (x_ref, w1_ref, b1_ref, w2_ref, ws_ref, bf_ref, o_ref,
             xb_ref, yb_ref, c1_ref, c2_ref) = refs
        else:
            (x_ref, w1_ref, b1_ref, w2_ref, bf_ref, o_ref,
             xb_ref, yb_ref, c1_ref, c2_ref) = refs
            ws_ref = None

        # ---- boundary masks built in-kernel (no HBM mask input) -------------
        # exact float arithmetic for indices < 2^24
        q = lax.broadcasted_iota(jnp.int32, (1, N), 1).astype(jnp.float32)
        p = q - jnp.floor(q / HW) * HW          # pixel index within its image
        i = jnp.floor(p / W)                    # row
        j = p - i * W                           # col
        row_m = (i >= 1.0, None, i <= H - 2.0)  # dh = 0, 1, 2
        col_m = (j >= 1.0, None, j <= W - 2.0)  # dw = 0, 1, 2

        def tap_mask(dh, dw):
            m, c = row_m[dh], col_m[dw]
            if m is None:
                return c
            return m if c is None else (m & c)

        # ---- concat the TB images onto the lane axis (prefix stays garbage,
        #      every read of it is masked below, so no zero-init is needed) ---
        for t in range(TB):
            xb_ref[:, P + t * HW:P + (t + 1) * HW] = x_ref[t]

        def im2col(src_ref, cols_ref, C):
            # 9 shifted, boundary-masked lane slices -> (9*C, N) scratch.
            for dh in range(3):
                for dw in range(3):
                    off = dh * W + dw
                    v = src_ref[:, off:off + N]
                    m = tap_mask(dh, dw)
                    if m is not None:
                        v = jnp.where(m, v, 0.0)   # select: garbage/NaN safe
                    r0 = (dh * 3 + dw) * C
                    cols_ref[r0:r0 + C, :] = v

        # ---- conv1 (+ folded BN1) + ReLU: ONE bf16 MXU matmul, K = 9*C_in ---
        im2col(xb_ref, c1_ref, C_in)
        acc1 = jnp.dot(w1_ref[...], c1_ref[...].astype(jnp.bfloat16),
                       preferred_element_type=jnp.float32)
        y1 = jnp.maximum(acc1 + b1_ref[...], 0.0)

        # ---- conv2 (+ folded BN2): same trick on the intermediate, K = 9*C_out
        yb_ref[:, P:P + N] = y1
        im2col(yb_ref, c2_ref, C_out)
        acc2 = jnp.dot(w2_ref[...], c2_ref[...].astype(jnp.bfloat16),
                       preferred_element_type=jnp.float32)

        # ---- shortcut --------------------------------------------------------
        xin = xb_ref[:, P:P + N]
        if has_proj:
            sc = jnp.dot(ws_ref[...], xin.astype(jnp.bfloat16),
                         preferred_element_type=jnp.float32)
        else:
            sc = xin                    # identity: exact f32 add, no matmul

        out = jnp.maximum(acc2 + sc + bf_ref[...], 0.0)

        # ---- lane-dense stores: one (C_out, H*W) slab per image -------------
        for t in range(TB):
            o_ref[t] = out[:, t * HW:(t + 1) * HW]

    return kernel


def _fold_bn(w, gamma, beta, mean, var, eps=1e-5):
    """Fold an inference-mode BatchNorm following a bias-free conv into the conv."""
    scale = gamma / jnp.sqrt(var + eps)
    return w * scale[:, None, None, None], beta - mean * scale


def _pack3x3(w):
    """(O, I, 3, 3) -> (O, 9*I); row order matches the im2col scratch rows."""
    O, I = w.shape[0], w.shape[1]
    return jnp.transpose(w, (0, 2, 3, 1)).reshape(O, 9 * I)


def residual_block_2d(x, params, *, stride=1):
    """x: (B, C_in, H, W) float32 -> (B, C_out, H, W) float32."""
    if stride != 1:
        raise NotImplementedError("stride != 1 not supported")  # TODO(synk)
    B, C_in, H, W = x.shape
    C_out = params["w1"].shape[0]
    HW = H * W
    has_proj = params.get("ws") is not None
    if not has_proj:
        assert C_in == C_out, "identity shortcut requires in_ch == out_ch"

    # ---- fold the BatchNorms into the convolutions (inference mode) --------
    w1f, b1f = _fold_bn(params["w1"], params["g1"], params["b1"], params["m1"], params["v1"])
    w2f, b2f = _fold_bn(params["w2"], params["g2"], params["b2"], params["m2"], params["v2"])
    if has_proj:
        wsf, bsf = _fold_bn(params["ws"], params["gs"], params["bs"], params["ms"], params["vs"])
        ws2 = wsf[:, :, 0, 0].astype(jnp.bfloat16)               # (C_out, C_in)
    else:
        bsf = jnp.zeros((C_out,), jnp.float32)
        ws2 = None

    w1p = _pack3x3(w1f).astype(jnp.bfloat16)                     # (C_out, 9*C_in)
    w2p = _pack3x3(w2f).astype(jnp.bfloat16)                     # (C_out, 9*C_out)
    b1v = b1f.reshape(C_out, 1).astype(jnp.float32)
    bfv = (b2f + bsf).reshape(C_out, 1).astype(jnp.float32)      # pre-summed epilogue bias

    TB = _pick_tb(B, HW)
    G = B // TB
    N = TB * HW
    Lb = _round_up(N + 2 * (W + 1), 128)                         # staging-buffer lanes

    # contiguous reshape only (no extra HBM pass): kernel consumes raw NCHW data
    x3 = x.astype(jnp.float32).reshape(B, C_in, HW)

    const = lambda shape: pl.BlockSpec(shape, lambda b, _s=shape: (0,) * len(_s))
    in_specs = [pl.BlockSpec((TB, C_in, HW), lambda b: (b, 0, 0)),
                const((C_out, 9 * C_in)),
                const((C_out, 1)),
                const((C_out, 9 * C_out))]
    args = [x3, w1p, b1v, w2p]
    if has_proj:
        in_specs.append(const((C_out, C_in)))
        args.append(ws2)
    in_specs.append(const((C_out, 1)))
    args.append(bfv)

    scratch = [pltpu.VMEM((C_in, Lb), jnp.float32),       # staged input (lane-concat batch)
               pltpu.VMEM((C_out, Lb), jnp.float32),      # staged intermediate y1
               pltpu.VMEM((9 * C_in, N), jnp.float32),    # im2col for conv1
               pltpu.VMEM((9 * C_out, N), jnp.float32)]   # im2col for conv2

    est = (2 * TB * (C_in + C_out) * HW * 4               # double-buffered in/out blocks
           + (C_in + C_out) * Lb * 4                      # staging scratch
           + 9 * (C_in + C_out) * N * 4                   # im2col scratch
           + 4 * (C_out * 9 * C_in + C_out * 9 * C_out + C_out * C_in + 4 * C_out))
    vmem_limit = int(min(64 << 20, max(32 << 20, 2 * est)))

    out = pl.pallas_call(
        _make_kernel(H, W, C_in, C_out, TB, has_proj),
        out_shape=jax.ShapeDtypeStruct((B, C_out, HW), jnp.float32),
        grid=(G,),
        in_specs=in_specs,
        out_specs=pl.BlockSpec((TB, C_out, HW), lambda b: (b, 0, 0)),
        scratch_shapes=scratch,
        compiler_params=pltpu.CompilerParams(
            dimension_semantics=("parallel",),
            vmem_limit_bytes=vmem_limit),
    )(*args)

    return out.reshape(B, C_out, H, W)                    # contiguous reshape only


def _reference(x, params, stride=1):
    """Pure-JAX f32 reference of the PyTorch forward (inference-mode BN)."""
    dn = ("NCHW", "OIHW", "NCHW")
    hi = jax.lax.Precision.HIGHEST

    def bn(y, g, b, m, v, eps=1e-5):
        s = g / jnp.sqrt(v + eps)
        return y * s[None, :, None, None] + (b - m * s)[None, :, None, None]

    y = jax.lax.conv_general_dilated(x, params["w1"], (stride, stride),
                                     ((1, 1), (1, 1)), dimension_numbers=dn, precision=hi)
    y = jnp.maximum(bn(y, params["g1"], params["b1"], params["m1"], params["v1"]), 0.0)
    y = jax.lax.conv_general_dilated(y, params["w2"], (1, 1),
                                     ((1, 1), (1, 1)), dimension_numbers=dn, precision=hi)
    y = bn(y, params["g2"], params["b2"], params["m2"], params["v2"])
    if params.get("ws") is not None:
        s = jax.lax.conv_general_dilated(x, params["ws"], (stride, stride),
                                         ((0, 0), (0, 0)), dimension_numbers=dn, precision=hi)
        s = bn(s, params["gs"], params["bs"], params["ms"], params["vs"])
    else:
        s = x
    return jnp.maximum(y + s, 0.0)


if __name__ == "__main__":
    root = jax.random.PRNGKey(0)

    def bn_params(k, c):
        k1, k2, k3, k4 = jax.random.split(k, 4)
        return (1.0 + 0.1 * jax.random.normal(k1, (c,), jnp.float32),
                0.1 * jax.random.normal(k2, (c,), jnp.float32),
                0.1 * jax.random.normal(k3, (c,), jnp.float32),
                0.5 + jax.random.uniform(k4, (c,), jnp.float32))

    def make_params(k, c_in, c_out, projection):
        ks = jax.random.split(k, 6)
        p = {"w1": 0.1 * jax.random.normal(ks[0], (c_out, c_in, 3, 3), jnp.float32),
             "w2": 0.1 * jax.random.normal(ks[2], (c_out, c_out, 3, 3), jnp.float32)}
        p["g1"], p["b1"], p["m1"], p["v1"] = bn_params(ks[1], c_out)
        p["g2"], p["b2"], p["m2"], p["v2"] = bn_params(ks[3], c_out)
        if projection:
            p["ws"] = 0.1 * jax.random.normal(ks[4], (c_out, c_in, 1, 1), jnp.float32)
            p["gs"], p["bs"], p["ms"], p["vs"] = bn_params(ks[5], c_out)
        else:
            p["ws"] = None
        return p

    H, W = 16, 16
    cases = [
        ("projection_shortcut", 2, 4, 8, True),   # in_ch != out_ch -> 1x1 conv + BN shortcut
        ("identity_shortcut", 2, 8, 8, False),    # in_ch == out_ch -> identity shortcut
        ("batched_projection", 4, 4, 8, True),    # exercises TB=2 (batch folded into lanes)
    ]
    keys = jax.random.split(root, 2 * len(cases))
    for i, (name, b, c_in, c_out, proj) in enumerate(cases):
        x = jax.random.normal(keys[2 * i], (b, c_in, H, W), jnp.float32)
        params = make_params(keys[2 * i + 1], c_in, c_out, proj)

        out = jax.block_until_ready(residual_block_2d(x, params))
        ref = _reference(x, params)
        assert out.shape == ref.shape, (name, out.shape, ref.shape)
        # bf16 MXU operands (f32 accumulation) -> slightly looser tolerance than pure f32
        assert jnp.allclose(out, ref, atol=3e-2, rtol=3e-2), (
            name, float(jnp.max(jnp.abs(out - ref))))

    print("KERNEL_OK")
</pallas_src>

<mosaic_0001>
module attributes {stable_mosaic.version = 11 : i64} {
  func.func @kernel(%arg0: i32, %arg1: memref<1x4x256xf32, #tpu.memory_space<vmem>>, %arg2: memref<8x36xbf16, #tpu.memory_space<vmem>>, %arg3: memref<8x1xf32, #tpu.memory_space<vmem>>, %arg4: memref<8x72xbf16, #tpu.memory_space<vmem>>, %arg5: memref<8x4xbf16, #tpu.memory_space<vmem>>, %arg6: memref<8x1xf32, #tpu.memory_space<vmem>>, %arg7: memref<1x8x256xf32, #tpu.memory_space<vmem>>, %arg8: memref<4x384xf32, #tpu.memory_space<vmem>>, %arg9: memref<8x384xf32, #tpu.memory_space<vmem>>, %arg10: memref<36x256xf32, #tpu.memory_space<vmem>>, %arg11: memref<72x256xf32, #tpu.memory_space<vmem>>) attributes {dimension_semantics = [#tpu.dimension_semantics<parallel>], iteration_bounds = array<i64: 2>, scalar_prefetch = 0 : i64, scratch_operands = 4 : i64, tpu.core_type = #tpu.core_type<tc>, window_params = [{transform_indices = @transform_0, window_bounds = array<i64: 1, 4, 256>}, {pipeline_mode = #tpu.pipeline_mode<synchronous>, transform_indices = @transform_1, window_bounds = array<i64: 8, 36>}, {pipeline_mode = #tpu.pipeline_mode<synchronous>, transform_indices = @transform_2, window_bounds = array<i64: 8, 1>}, {pipeline_mode = #tpu.pipeline_mode<synchronous>, transform_indices = @transform_3, window_bounds = array<i64: 8, 72>}, {pipeline_mode = #tpu.pipeline_mode<synchronous>, transform_indices = @transform_4, window_bounds = array<i64: 8, 4>}, {pipeline_mode = #tpu.pipeline_mode<synchronous>, transform_indices = @transform_5, window_bounds = array<i64: 8, 1>}, {transform_indices = @transform_6, window_bounds = array<i64: 1, 8, 256>}]} {
    %0 = tpu.iota {dimensions = array<i32: 1>} : vector<1x256xi32>
    %1 = arith.sitofp %0 : vector<1x256xi32> to vector<1x256xf32>
    %cst = arith.constant 2.560000e+02 : f32
    %2 = vector.broadcast %cst : f32 to vector<1x256xf32>
    %3 = arith.divf %1, %2 : vector<1x256xf32>
    %4 = math.floor %3 : vector<1x256xf32>
    %cst_0 = arith.constant 2.560000e+02 : f32
    %5 = vector.broadcast %cst_0 : f32 to vector<1x256xf32>
    %6 = arith.mulf %4, %5 : vector<1x256xf32>
    %7 = arith.subf %1, %6 : vector<1x256xf32>
    %cst_1 = arith.constant 1.600000e+01 : f32
    %8 = vector.broadcast %cst_1 : f32 to vector<1x256xf32>
    %9 = arith.divf %7, %8 : vector<1x256xf32>
    %10 = math.floor %9 : vector<1x256xf32>
    %cst_2 = arith.constant 1.600000e+01 : f32
    %11 = vector.broadcast %cst_2 : f32 to vector<1x256xf32>
    %12 = arith.mulf %10, %11 : vector<1x256xf32>
    %13 = arith.subf %7, %12 : vector<1x256xf32>
    %cst_3 = arith.constant 1.000000e+00 : f32
    %14 = vector.broadcast %cst_3 : f32 to vector<1x256xf32>
    %15 = arith.cmpf oge, %10, %14 : vector<1x256xf32>
    %cst_4 = arith.constant 1.400000e+01 : f32
    %16 = vector.broadcast %cst_4 : f32 to vector<1x256xf32>
    %17 = arith.cmpf ole, %10, %16 : vector<1x256xf32>
    %cst_5 = arith.constant 1.000000e+00 : f32
    %18 = vector.broadcast %cst_5 : f32 to vector<1x256xf32>
    %19 = arith.cmpf oge, %13, %18 : vector<1x256xf32>
    %cst_6 = arith.constant 1.400000e+01 : f32
    %20 = vector.broadcast %cst_6 : f32 to vector<1x256xf32>
    %21 = arith.cmpf ole, %13, %20 : vector<1x256xf32>
    %c0 = arith.constant 0 : index
    %c0_7 = arith.constant 0 : index
    %c0_8 = arith.constant 0 : index
    %22 = vector.load %arg1[%c0, %c0_7, %c0_8] : memref<1x4x256xf32, #tpu.memory_space<vmem>>, vector<1x4x256xf32>
    %23 = vector.shape_cast %22 : vector<1x4x256xf32> to vector<4x256xf32>
    %c0_9 = arith.constant 0 : index
    %c17 = arith.constant 17 : index
    %24 = vector.load %arg8[%c0_9, %c17] : memref<4x384xf32, #tpu.memory_space<vmem>>, vector<4x256xf32>
    tpu.vector_store %arg8[%c0_9, %c17], %23 {strides = array<i32>} : memref<4x384xf32, #tpu.memory_space<vmem>>, vector<4x256xf32>,
    %c0_10 = arith.constant 0 : index
    %c0_11 = arith.constant 0 : index
    %25 = vector.load %arg8[%c0_10, %c0_11] : memref<4x384xf32, #tpu.memory_space<vmem>>, vector<4x256xf32>
    %26 = arith.andi %15, %19 : vector<1x256xi1>
    %cst_12 = arith.constant 0.000000e+00 : f32
    %27 = vector.shape_cast %26 : vector<1x256xi1> to vector<1x256xi1>
    %28 = vector.broadcast %27 : vector<1x256xi1> to vector<4x256xi1>
    %29 = vector.broadcast %cst_12 : f32 to vector<4x256xf32>
    %30 = arith.select %28, %25, %29 : vector<4x256xi1>, vector<4x256xf32>
    %c0_13 = arith.constant 0 : index
    %c0_14 = arith.constant 0 : index
    %31 = vector.load %arg10[%c0_13, %c0_14] : memref<36x256xf32, #tpu.memory_space<vmem>>, vector<4x256xf32>
    tpu.vector_store %arg10[%c0_13, %c0_14], %30 {strides = array<i32>} : memref<36x256xf32, #tpu.memory_space<vmem>>, vector<4x256xf32>,
    %c0_15 = arith.constant 0 : index
    %c1 = arith.constant 1 : index
    %32 = vector.load %arg8[%c0_15, %c1] : memref<4x384xf32, #tpu.memory_space<vmem>>, vector<4x256xf32>
    %cst_16 = arith.constant 0.000000e+00 : f32
    %33 = vector.shape_cast %15 : vector<1x256xi1> to vector<1x256xi1>
    %34 = vector.broadcast %33 : vector<1x256xi1> to vector<4x256xi1>
    %35 = vector.broadcast %cst_16 : f32 to vector<4x256xf32>
    %36 = arith.select %34, %32, %35 : vector<4x256xi1>, vector<4x256xf32>
    %c4 = arith.constant 4 : index
    %c0_17 = arith.constant 0 : index
    %37 = vector.load %arg10[%c4, %c0_17] : memref<36x256xf32, #tpu.memory_space<vmem>>, vector<4x256xf32>
    tpu.vector_store %arg10[%c4, %c0_17], %36 {strides = array<i32>} : memref<36x256xf32, #tpu.memory_space<vmem>>, vector<4x256xf32>,
    %c0_18 = arith.constant 0 : index
    %c2 = arith.constant 2 : index
    %38 = vector.load %arg8[%c0_18, %c2] : memref<4x384xf32, #tpu.memory_space<vmem>>, vector<4x256xf32>
    %39 = arith.andi %15, %21 : vector<1x256xi1>
    %cst_19 = arith.constant 0.000000e+00 : f32
    %40 = vector.shape_cast %39 : vector<1x256xi1> to vector<1x256xi1>
    %41 = vector.broadcast %40 : vector<1x256xi1> to vector<4x256xi1>
    %42 = vector.broadcast %cst_19 : f32 to vector<4x256xf32>
    %43 = arith.select %41, %38, %42 : vector<4x256xi1>, vector<4x256xf32>
    %c8 = arith.constant 8 : index
    %c0_20 = arith.constant 0 : index
    %44 = vector.load %arg10[%c8, %c0_20] : memref<36x256xf32, #tpu.memory_space<vmem>>, vector<4x256xf32>
    tpu.vector_store %arg10[%c8, %c0_20], %43 {strides = array<i32>} : memref<36x256xf32, #tpu.memory_space<vmem>>, vector<4x256xf32>,
    %c0_21 = arith.constant 0 : index
    %c16 = arith.constant 16 : index
    %45 = vector.load %arg8[%c0_21, %c16] : memref<4x384xf32, #tpu.memory_space<vmem>>, vector<4x256xf32>
    %cst_22 = arith.constant 0.000000e+00 : f32
    %46 = vector.shape_cast %19 : vector<1x256xi1> to vector<1x256xi1>
    %47 = vector.broadcast %46 : vector<1x256xi1> to vector<4x256xi1>
    %48 = vector.broadcast %cst_22 : f32 to vector<4x256xf32>
    %49 = arith.select %47, %45, %48 : vector<4x256xi1>, vector<4x256xf32>
    %c12 = arith.constant 12 : index
    %c0_23 = arith.constant 0 : index
    %50 = vector.load %arg10[%c12, %c0_23] : memref<36x256xf32, #tpu.memory_space<vmem>>, vector<4x256xf32>
    tpu.vector_store %arg10[%c12, %c0_23], %49 {strides = array<i32>} : memref<36x256xf32, #tpu.memory_space<vmem>>, vector<4x256xf32>,
    %c0_24 = arith.constant 0 : index
    %c17_25 = arith.constant 17 : index
    %51 = vector.load %arg8[%c0_24, %c17_25] : memref<4x384xf32, #tpu.memory_space<vmem>>, vector<4x256xf32>
    %c16_26 = arith.constant 16 : index
    %c0_27 = arith.constant 0 : index
    %52 = vector.load %arg10[%c16_26, %c0_27] : memref<36x256xf32, #tpu.memory_space<vmem>>, vector<4x256xf32>
    tpu.vector_store %arg10[%c16_26, %c0_27], %51 {strides = array<i32>} : memref<36x256xf32, #tpu.memory_space<vmem>>, vector<4x256xf32>,
    %c0_28 = arith.constant 0 : index
    %c18 = arith.constant 18 : index
    %53 = vector.load %arg8[%c0_28, %c18] : memref<4x384xf32, #tpu.memory_space<vmem>>, vector<4x256xf32>
    %cst_29 = arith.constant 0.000000e+00 : f32
    %54 = vector.shape_cast %21 : vector<1x256xi1> to vector<1x256xi1>
    %55 = vector.broadcast %54 : vector<1x256xi1> to vector<4x256xi1>
    %56 = vector.broadcast %cst_29 : f32 to vector<4x256xf32>
    %57 = arith.select %55, %53, %56 : vector<4x256xi1>, vector<4x256xf32>
    %c20 = arith.constant 20 : index
    %c0_30 = arith.constant 0 : index
    %58 = vector.load %arg10[%c20, %c0_30] : memref<36x256xf32, #tpu.memory_space<vmem>>, vector<4x256xf32>
    tpu.vector_store %arg10[%c20, %c0_30], %57 {strides = array<i32>} : memref<36x256xf32, #tpu.memory_space<vmem>>, vector<4x256xf32>,
    %c0_31 = arith.constant 0 : index
    %c32 = arith.constant 32 : index
    %59 = vector.load %arg8[%c0_31, %c32] : memref<4x384xf32, #tpu.memory_space<vmem>>, vector<4x256xf32>
    %60 = arith.andi %17, %19 : vector<1x256xi1>
    %cst_32 = arith.constant 0.000000e+00 : f32
    %61 = vector.shape_cast %60 : vector<1x256xi1> to vector<1x256xi1>
    %62 = vector.broadcast %61 : vector<1x256xi1> to vector<4x256xi1>
    %63 = vector.broadcast %cst_32 : f32 to vector<4x256xf32>
    %64 = arith.select %62, %59, %63 : vector<4x256xi1>, vector<4x256xf32>
    %c24 = arith.constant 24 : index
    %c0_33 = arith.constant 0 : index
    %65 = vector.load %arg10[%c24, %c0_33] : memref<36x256xf32, #tpu.memory_space<vmem>>, vector<4x256xf32>
    tpu.vector_store %arg10[%c24, %c0_33], %64 {strides = array<i32>} : memref<36x256xf32, #tpu.memory_space<vmem>>, vector<4x256xf32>,
    %c0_34 = arith.constant 0 : index
    %c33 = arith.constant 33 : index
    %66 = vector.load %arg8[%c0_34, %c33] : memref<4x384xf32, #tpu.memory_space<vmem>>, vector<4x256xf32>
    %cst_35 = arith.constant 0.000000e+00 : f32
    %67 = vector.shape_cast %17 : vector<1x256xi1> to vector<1x256xi1>
    %68 = vector.broadcast %67 : vector<1x256xi1> to vector<4x256xi1>
    %69 = vector.broadcast %cst_35 : f32 to vector<4x256xf32>
    %70 = arith.select %68, %66, %69 : vector<4x256xi1>, vector<4x256xf32>
    %c28 = arith.constant 28 : index
    %c0_36 = arith.constant 0 : index
    %71 = vector.load %arg10[%c28, %c0_36] : memref<36x256xf32, #tpu.memory_space<vmem>>, vector<4x256xf32>
    tpu.vector_store %arg10[%c28, %c0_36], %70 {strides = array<i32>} : memref<36x256xf32, #tpu.memory_space<vmem>>, vector<4x256xf32>,
    %c0_37 = arith.constant 0 : index
    %c34 = arith.constant 34 : index
    %72 = vector.load %arg8[%c0_37, %c34] : memref<4x384xf32, #tpu.memory_space<vmem>>, vector<4x256xf32>
    %73 = arith.andi %17, %21 : vector<1x256xi1>
    %cst_38 = arith.constant 0.000000e+00 : f32
    %74 = vector.shape_cast %73 : vector<1x256xi1> to vector<1x256xi1>
    %75 = vector.broadcast %74 : vector<1x256xi1> to vector<4x256xi1>
    %76 = vector.broadcast %cst_38 : f32 to vector<4x256xf32>
    %77 = arith.select %75, %72, %76 : vector<4x256xi1>, vector<4x256xf32>
    %c32_39 = arith.constant 32 : index
    %c0_40 = arith.constant 0 : index
    %78 = vector.load %arg10[%c32_39, %c0_40] : memref<36x256xf32, #tpu.memory_space<vmem>>, vector<4x256xf32>
    tpu.vector_store %arg10[%c32_39, %c0_40], %77 {strides = array<i32>} : memref<36x256xf32, #tpu.memory_space<vmem>>, vector<4x256xf32>,
    %c0_41 = arith.constant 0 : index
    %c0_42 = arith.constant 0 : index
    %79 = vector.load %arg2[%c0_41, %c0_42] : memref<8x36xbf16, #tpu.memory_space<vmem>>, vector<8x36xbf16>
    %c0_43 = arith.constant 0 : index
    %c0_44 = arith.constant 0 : index
    %80 = vector.load %arg10[%c0_43, %c0_44] : memref<36x256xf32, #tpu.memory_space<vmem>>, vector<36x256xf32>
    %81 = arith.truncf %80 : vector<36x256xf32> to vector<36x256xbf16>
    %cst_45 = arith.constant dense<0.000000e+00> : vector<8x256xf32>
    %82 = tpu.matmul %79, %81, %cst_45 {dimension_numbers = #tpu.dot_dimension_numbers<[1], [0], [0], [1], [0, 0, 1, 1], [], []>} : vector<8x36xbf16>, vector<36x256xbf16>, vector<8x256xf32> -> vector<8x256xf32>
    %c0_46 = arith.constant 0 : index
    %c0_47 = arith.constant 0 : index
    %83 = vector.load %arg3[%c0_46, %c0_47] : memref<8x1xf32, #tpu.memory_space<vmem>>, vector<8x1xf32>
    %84 = vector.broadcast %83 : vector<8x1xf32> to vector<8x256xf32>
    %85 = arith.addf %82, %84 : vector<8x256xf32>
    %cst_48 = arith.constant 0.000000e+00 : f32
    %86 = vector.broadcast %cst_48 : f32 to vector<8x256xf32>
    %87 = arith.maximumf %85, %86 : vector<8x256xf32>
    %c0_49 = arith.constant 0 : index
    %c17_50 = arith.constant 17 : index
    %88 = vector.load %arg9[%c0_49, %c17_50] : memref<8x384xf32, #tpu.memory_space<vmem>>, vector<8x256xf32>
    tpu.vector_store %arg9[%c0_49, %c17_50], %87 {strides = array<i32>} : memref<8x384xf32, #tpu.memory_space<vmem>>, vector<8x256xf32>,
    %c0_51 = arith.constant 0 : index
    %c0_52 = arith.constant 0 : index
    %89 = vector.load %arg9[%c0_51, %c0_52] : memref<8x384xf32, #tpu.memory_space<vmem>>, vector<8x256xf32>
    %90 = arith.andi %15, %19 : vector<1x256xi1>
    %cst_53 = arith.constant 0.000000e+00 : f32
    %91 = vector.shape_cast %90 : vector<1x256xi1> to vector<1x256xi1>
    %92 = vector.broadcast %91 : vector<1x256xi1> to vector<8x256xi1>
    %93 = vector.broadcast %cst_53 : f32 to vector<8x256xf32>
    %94 = arith.select %92, %89, %93 : vector<8x256xi1>, vector<8x256xf32>
    %c0_54 = arith.constant 0 : index
    %c0_55 = arith.constant 0 : index
    %95 = vector.load %arg11[%c0_54, %c0_55] : memref<72x256xf32, #tpu.memory_space<vmem>>, vector<8x256xf32>
    tpu.vector_store %arg11[%c0_54, %c0_55], %94 {strides = array<i32>} : memref<72x256xf32, #tpu.memory_space<vmem>>, vector<8x256xf32>,
    %c0_56 = arith.constant 0 : index
    %c1_57 = arith.constant 1 : index
    %96 = vector.load %arg9[%c0_56, %c1_57] : memref<8x384xf32, #tpu.memory_space<vmem>>, vector<8x256xf32>
    %cst_58 = arith.constant 0.000000e+00 : f32
    %97 = vector.shape_cast %15 : vector<1x256xi1> to vector<1x256xi1>
    %98 = vector.broadcast %97 : vector<1x256xi1> to vector<8x256xi1>
    %99 = vector.broadcast %cst_58 : f32 to vector<8x256xf32>
    %100 = arith.select %98, %96, %99 : vector<8x256xi1>, vector<8x256xf32>
    %c8_59 = arith.constant 8 : index
    %c0_60 = arith.constant 0 : index
    %101 = vector.load %arg11[%c8_59, %c0_60] : memref<72x256xf32, #tpu.memory_space<vmem>>, vector<8x256xf32>
    tpu.vector_store %arg11[%c8_59, %c0_60], %100 {strides = array<i32>} : memref<72x256xf32, #tpu.memory_space<vmem>>, vector<8x256xf32>,
    %c0_61 = arith.constant 0 : index
    %c2_62 = arith.constant 2 : index
    %102 = vector.load %arg9[%c0_61, %c2_62] : memref<8x384xf32, #tpu.memory_space<vmem>>, vector<8x256xf32>
    %103 = arith.andi %15, %21 : vector<1x256xi1>
    %cst_63 = arith.constant 0.000000e+00 : f32
    %104 = vector.shape_cast %103 : vector<1x256xi1> to vector<1x256xi1>
    %105 = vector.broadcast %104 : vector<1x256xi1> to vector<8x256xi1>
    %106 = vector.broadcast %cst_63 : f32 to vector<8x256xf32>
    %107 = arith.select %105, %102, %106 : vector<8x256xi1>, vector<8x256xf32>
    %c16_64 = arith.constant 16 : index
    %c0_65 = arith.constant 0 : index
    %108 = vector.load %arg11[%c16_64, %c0_65] : memref<72x256xf32, #tpu.memory_space<vmem>>, vector<8x256xf32>
    tpu.vector_store %arg11[%c16_64, %c0_65], %107 {strides = array<i32>} : memref<72x256xf32, #tpu.memory_space<vmem>>, vector<8x256xf32>,
    %c0_66 = arith.constant 0 : index
    %c16_67 = arith.constant 16 : index
    %109 = vector.load %arg9[%c0_66, %c16_67] : memref<8x384xf32, #tpu.memory_space<vmem>>, vector<8x256xf32>
    %cst_68 = arith.constant 0.000000e+00 : f32
    %110 = vector.shape_cast %19 : vector<1x256xi1> to vector<1x256xi1>
    %111 = vector.broadcast %110 : vector<1x256xi1> to vector<8x256xi1>
    %112 = vector.broadcast %cst_68 : f32 to vector<8x256xf32>
    %113 = arith.select %111, %109, %112 : vector<8x256xi1>, vector<8x256xf32>
    %c24_69 = arith.constant 24 : index
    %c0_70 = arith.constant 0 : index
    %114 = vector.load %arg11[%c24_69, %c0_70] : memref<72x256xf32, #tpu.memory_space<vmem>>, vector<8x256xf32>
    tpu.vector_store %arg11[%c24_69, %c0_70], %113 {strides = array<i32>} : memref<72x256xf32, #tpu.memory_space<vmem>>, vector<8x256xf32>,
    %c0_71 = arith.constant 0 : index
    %c17_72 = arith.constant 17 : index
    %115 = vector.load %arg9[%c0_71, %c17_72] : memref<8x384xf32, #tpu.memory_space<vmem>>, vector<8x256xf32>
    %c32_73 = arith.constant 32 : index
    %c0_74 = arith.constant 0 : index
    %116 = vector.load %arg11[%c32_73, %c0_74] : memref<72x256xf32, #tpu.memory_space<vmem>>, vector<8x256xf32>
    tpu.vector_store %arg11[%c32_73, %c0_74], %115 {strides = array<i32>} : memref<72x256xf32, #tpu.memory_space<vmem>>, vector<8x256xf32>,
    %c0_75 = arith.constant 0 : index
    %c18_76 = arith.constant 18 : index
    %117 = vector.load %arg9[%c0_75, %c18_76] : memref<8x384xf32, #tpu.memory_space<vmem>>, vector<8x256xf32>
    %cst_77 = arith.constant 0.000000e+00 : f32
    %118 = vector.shape_cast %21 : vector<1x256xi1> to vector<1x256xi1>
    %119 = vector.broadcast %118 : vector<1x256xi1> to vector<8x256xi1>
    %120 = vector.broadcast %cst_77 : f32 to vector<8x256xf32>
    %121 = arith.select %119, %117, %120 : vector<8x256xi1>, vector<8x256xf32>
    %c40 = arith.constant 40 : index
    %c0_78 = arith.constant 0 : index
    %122 = vector.load %arg11[%c40, %c0_78] : memref<72x256xf32, #tpu.memory_space<vmem>>, vector<8x256xf32>
    tpu.vector_store %arg11[%c40, %c0_78], %121 {strides = array<i32>} : memref<72x256xf32, #tpu.memory_space<vmem>>, vector<8x256xf32>,
    %c0_79 = arith.constant 0 : index
    %c32_80 = arith.constant 32 : index
    %123 = vector.load %arg9[%c0_79, %c32_80] : memref<8x384xf32, #tpu.memory_space<vmem>>, vector<8x256xf32>
    %124 = arith.andi %17, %19 : vector<1x256xi1>
    %cst_81 = arith.constant 0.000000e+00 : f32
    %125 = vector.shape_cast %124 : vector<1x256xi1> to vector<1x256xi1>
    %126 = vector.broadcast %125 : vector<1x256xi1> to vector<8x256xi1>
    %127 = vector.broadcast %cst_81 : f32 to vector<8x256xf32>
    %128 = arith.select %126, %123, %127 : vector<8x256xi1>, vector<8x256xf32>
    %c48 = arith.constant 48 : index
    %c0_82 = arith.constant 0 : index
    %129 = vector.load %arg11[%c48, %c0_82] : memref<72x256xf32, #tpu.memory_space<vmem>>, vector<8x256xf32>
    tpu.vector_store %arg11[%c48, %c0_82], %128 {strides = array<i32>} : memref<72x256xf32, #tpu.memory_space<vmem>>, vector<8x256xf32>,
    %c0_83 = arith.constant 0 : index
    %c33_84 = arith.constant 33 : index
    %130 = vector.load %arg9[%c0_83, %c33_84] : memref<8x384xf32, #tpu.memory_space<vmem>>, vector<8x256xf32>
    %cst_85 = arith.constant 0.000000e+00 : f32
    %131 = vector.shape_cast %17 : vector<1x256xi1> to vector<1x256xi1>
    %132 = vector.broadcast %131 : vector<1x256xi1> to vector<8x256xi1>
    %133 = vector.broadcast %cst_85 : f32 to vector<8x256xf32>
    %134 = arith.select %132, %130, %133 : vector<8x256xi1>, vector<8x256xf32>
    %c56 = arith.constant 56 : index
    %c0_86 = arith.constant 0 : index
    %135 = vector.load %arg11[%c56, %c0_86] : memref<72x256xf32, #tpu.memory_space<vmem>>, vector<8x256xf32>
    tpu.vector_store %arg11[%c56, %c0_86], %134 {strides = array<i32>} : memref<72x256xf32, #tpu.memory_space<vmem>>, vector<8x256xf32>,
    %c0_87 = arith.constant 0 : index
    %c34_88 = arith.constant 34 : index
    %136 = vector.load %arg9[%c0_87, %c34_88] : memref<8x384xf32, #tpu.memory_space<vmem>>, vector<8x256xf32>
    %137 = arith.andi %17, %21 : vector<1x256xi1>
    %cst_89 = arith.constant 0.000000e+00 : f32
    %138 = vector.shape_cast %137 : vector<1x256xi1> to vector<1x256xi1>
    %139 = vector.broadcast %138 : vector<1x256xi1> to vector<8x256xi1>
    %140 = vector.broadcast %cst_89 : f32 to vector<8x256xf32>
    %141 = arith.select %139, %136, %140 : vector<8x256xi1>, vector<8x256xf32>
    %c64 = arith.constant 64 : index
    %c0_90 = arith.constant 0 : index
    %142 = vector.load %arg11[%c64, %c0_90] : memref<72x256xf32, #tpu.memory_space<vmem>>, vector<8x256xf32>
    tpu.vector_store %arg11[%c64, %c0_90], %141 {strides = array<i32>} : memref<72x256xf32, #tpu.memory_space<vmem>>, vector<8x256xf32>,
    %c0_91 = arith.constant 0 : index
    %c0_92 = arith.constant 0 : index
    %143 = vector.load %arg4[%c0_91, %c0_92] : memref<8x72xbf16, #tpu.memory_space<vmem>>, vector<8x72xbf16>
    %c0_93 = arith.constant 0 : index
    %c0_94 = arith.constant 0 : index
    %144 = vector.load %arg11[%c0_93, %c0_94] : memref<72x256xf32, #tpu.memory_space<vmem>>, vector<72x256xf32>
    %145 = arith.truncf %144 : vector<72x256xf32> to vector<72x256xbf16>
    %cst_95 = arith.constant dense<0.000000e+00> : vector<8x256xf32>
    %146 = tpu.matmul %143, %145, %cst_95 {dimension_numbers = #tpu.dot_dimension_numbers<[1], [0], [0], [1], [0, 0, 1, 1], [], []>} : vector<8x72xbf16>, vector<72x256xbf16>, vector<8x256xf32> -> vector<8x256xf32>
    %c0_96 = arith.constant 0 : index
    %c17_97 = arith.constant 17 : index
    %147 = vector.load %arg8[%c0_96, %c17_97] : memref<4x384xf32, #tpu.memory_space<vmem>>, vector<4x256xf32>
    %c0_98 = arith.constant 0 : index
    %c0_99 = arith.constant 0 : index
    %148 = vector.load %arg5[%c0_98, %c0_99] : memref<8x4xbf16, #tpu.memory_space<vmem>>, vector<8x4xbf16>
    %149 = arith.truncf %147 : vector<4x256xf32> to vector<4x256xbf16>
    %cst_100 = arith.constant dense<0.000000e+00> : vector<8x256xf32>
    %150 = tpu.matmul %148, %149, %cst_100 {dimension_numbers = #tpu.dot_dimension_numbers<[1], [0], [0], [1], [0, 0, 1, 1], [], []>} : vector<8x4xbf16>, vector<4x256xbf16>, vector<8x256xf32> -> vector<8x256xf32>
    %151 = arith.addf %146, %150 : vector<8x256xf32>
    %c0_101 = arith.constant 0 : index
    %c0_102 = arith.constant 0 : index
    %152 = vector.load %arg6[%c0_101, %c0_102] : memref<8x1xf32, #tpu.memory_space<vmem>>, vector<8x1xf32>
    %153 = vector.broadcast %152 : vector<8x1xf32> to vector<8x256xf32>
    %154 = arith.addf %151, %153 : vector<8x256xf32>
    %cst_103 = arith.constant 0.000000e+00 : f32
    %155 = vector.broadcast %cst_103 : f32 to vector<8x256xf32>
    %156 = arith.maximumf %154, %155 : vector<8x256xf32>
    %c0_104 = arith.constant 0 : index
    %c0_105 = arith.constant 0 : index
    %c0_106 = arith.constant 0 : index
    %157 = vector.load %arg7[%c0_104, %c0_105, %c0_106] : memref<1x8x256xf32, #tpu.memory_space<vmem>>, vector<1x8x256xf32>
    %158 = vector.shape_cast %157 : vector<1x8x256xf32> to vector<8x256xf32>
    %159 = vector.shape_cast %156 : vector<8x256xf32> to vector<1x8x256xf32>
    tpu.vector_store %arg7[%c0_104, %c0_105, %c0_106], %159 {strides = array<i32>} : memref<1x8x256xf32, #tpu.memory_space<vmem>>, vector<1x8x256xf32>,
    return
  }
  func.func @transform_0(%arg0: i32) -> (i32, i32, i32) {
    %c0_i32 = arith.constant 0 : i32
    %c0_i32_0 = arith.constant 0 : i32
    %c0_i32_1 = arith.constant 0 : i32
    return %arg0, %c0_i32, %c0_i32_0 : i32, i32, i32
  }
  func.func @transform_1(%arg0: i32) -> (i32, i32) {
    %c0_i32 = arith.constant 0 : i32
    %c0_i32_0 = arith.constant 0 : i32
    %c0_i32_1 = arith.constant 0 : i32
    return %c0_i32, %c0_i32_0 : i32, i32
  }
  func.func @transform_2(%arg0: i32) -> (i32, i32) {
    %c0_i32 = arith.constant 0 : i32
    %c0_i32_0 = arith.constant 0 : i32
    %c0_i32_1 = arith.constant 0 : i32
    return %c0_i32, %c0_i32_0 : i32, i32
  }
  func.func @transform_3(%arg0: i32) -> (i32, i32) {
    %c0_i32 = arith.constant 0 : i32
    %c0_i32_0 = arith.constant 0 : i32
    %c0_i32_1 = arith.constant 0 : i32
    return %c0_i32, %c0_i32_0 : i32, i32
  }
  func.func @transform_4(%arg0: i32) -> (i32, i32) {
    %c0_i32 = arith.constant 0 : i32
    %c0_i32_0 = arith.constant 0 : i32
    %c0_i32_1 = arith.constant 0 : i32
    return %c0_i32, %c0_i32_0 : i32, i32
  }
  func.func @transform_5(%arg0: i32) -> (i32, i32) {
    %c0_i32 = arith.constant 0 : i32
    %c0_i32_0 = arith.constant 0 : i32
    %c0_i32_1 = arith.constant 0 : i32
    return %c0_i32, %c0_i32_0 : i32, i32
  }
  func.func @transform_6(%arg0: i32) -> (i32, i32, i32) {
    %c0_i32 = arith.constant 0 : i32
    %c0_i32_0 = arith.constant 0 : i32
    %c0_i32_1 = arith.constant 0 : i32
    return %arg0, %c0_i32, %c0_i32_0 : i32, i32, i32
  }
}

</mosaic_0001>

<bundles_post_ra>
// kernel: tpu_custom_call.1
= control target key start
LH: loop header
LB: loop body
LE: loop exit
PB: predicated region body
PF: predicated region fallthrough
CT: control target
= control target key end

     0   :  { %11 = vsyncpa [#allocation7], 0  ;;  %s1657_s0 = inlined_call_operand.vmem [shape: f32[2,4,256], index: 0, kind: input, shape index: {}]   ;;  %s1658_s1 = inlined_call_operand.vmem [shape: bf16[8,36], index: 1, kind: input, shape index: {}]   ;;  %s1659_s2 = inlined_call_operand.vmem [shape: f32[8,1], index: 2, kind: input, shape index: {}]   ;;  %s1660_s3 = inlined_call_operand.vmem [shape: bf16[8,72], index: 3, kind: input, shape index: {}]   ;;  %s1661_s4 = inlined_call_operand.vmem [shape: bf16[8,4], index: 4, kind: input, shape index: {}]   ;;  %s1662_s5 = inlined_call_operand.vmem [shape: f32[8,1], index: 5, kind: input, shape index: {}]   ;;  %s1663_s6 = inlined_call_operand.hbm [shape: f32[2,8,256], index: 6, kind: output, shape index: {}]  }
   0x1   :  { %13 = vsyncpa [#allocation7 + $0x1], 0  ;;  %s1267_s21 = smov 0   ;;  %s1269_s22 = smov 0  }
   0x2   :  { %s1271_s23 = smov 0   ;;  %s1273_s24 = smov 0  }
   0x3 LB: > { %s1288_s25 = sadd.s32 4294967295, %s1218_s24   ;;  %s1021_s26 = sadd.s32 4294967294, %s1218_s24   ;;  %s1218_s24 = sphi %s1273_s24, %s1729_s24   ;;  %s1214_s23 = sphi %s1271_s23, %s1728_s23   ;;  %s1210_s22 = sphi %s1269_s22, %s1727_s22   ;;  %s1206_s21 = sphi %s1267_s21, %s1726_s21  }
   0x4   : > { %s1292_s27 = sadd.s32 1, %s1218_s24   ;;  %s157_s28 = sadd.s32 1, %s1214_s23 }
   0x5   : > { %s154_s29 = ssub.s32 %s1218_s24, %s1292_s27  ;;  %p167_p0 = scmp.ne.s32.totalorder %s1214_s23, %s1210_s22 }
   0x6   : > { %p155_p1 = scmp.eq.s32.totalorder %s154_s29, 0  ;;  %p168_p2 = scmp.eq.s32.totalorder %s1288_s25, 1 }
   0x7   : > { %p173_p3 = scmp.ne.s32.totalorder %s1210_s22, %s1206_s21  ;;  %p174_p4 = scmp.eq.s32.totalorder %s1021_s26, 1 }
   0x8   : > { %s1303_s30 = scalar_select %p155_p1, %s1214_s23, %s157_s28  }
   0x9   : > { %p1305_p5 = por %p168_p2, %p167_p0  ;;  %p1309_p6 = por %p174_p4, %p173_p3 }
   0xa   : > { %p1024_p7 = scmp.ge.s32.totalorder %s1218_s24, 1  ;;  %p215_p8 = scmp.lt.s32.totalorder %s1218_s24, 3 }
   0xc   : > { %p216_p9 = pnand %p1024_p7, %p215_p8 }
   0xd   : > { %p245_p10 = scmp.lt.s32.totalorder (!%p216_p9), %s1288_s25, 1  ;;  %s1220_s14 = smov (!%p216_p9), 17  }
   0xe   : > { %219 = sbr.rel (%p216_p9) target bundleno = 1014 (0x3f6), region = 44  ;;  %s1221_s15 = smov (!%p216_p9), 94  }
   0xf   : > { %s1222_s16 = smov (!%p216_p9), 127   ;;  %s1223_s17 = smov (!%p216_p9), 110  }
  0x10   : > { %s1224_s18 = smov (!%p216_p9), 112   ;;  %s1225_s19 = smov (!%p216_p9), 95  }
  0x11   : > { %s1226_s20 = smov (!%p216_p9), 96   ;;  %s1227_s26 = smov (!%p216_p9), 111  }
  0x12   : > { %s1228_s28 = smov (!%p216_p9), 126  }
  0x13   : > { %s246_s9 = scalar_select %p245_p10, %s1288_s25, 1  ;;  %v251_v1 = vlaneseq  ;;  %vm291_vm0 = vcmask 1043592   ;;  %vm292_vm1 = vcmask 1047556   ;;  %vm1666_vm2 = vcmask 138240   ;;  %v544_v40 = vld [vmem:[%s1659_s2] sm:$0xff] }
  0x14   : > { %vm295_vm3 = vcmask 134144   ;;  %vm293_vm4 = vmor %vm292_vm1, %vm291_vm0  ;;  %v1229_v39 = vmov 0   ;;  %vm1664_vm11 = vcmask 900096   ;;  %vm1665_vm14 = vcmask 777216   ;;  %v782_v27 = vld [vmem:[%s1660_s3] sm:$0xf] }
  0x15   : > { %s1039_s10 = sshll.u32 %s246_s9, 3  ;;  %v252_v2 = vand.u32 127, %v251_v1  ;;  %593 = vmatprep.mubr.bf16.mxu0 %v1229_v39  ;;  %1115 = vset.pattern.permute.xlu1 %v1229_v39 }
  0x16   : > { %s249_s13 = scalar_lea.vmem %s1657_s0, %s1039_s10  ;;  %926 = vmatprep.mubr.bf16.mxu1 %v1229_v39  ;;  %1156 = vset.pattern.permute.xlu0 %v1229_v39 }
  0x17   : > { %v282_v0 = vld [vmem:[%s249_s13] sm:$0xff]  ;;  %v253_v3 = vadd.s32 128, %v252_v2  ;;  %v254_v4 = vcvt.s32.f32 %v252_v2 }
  0x18   : > { %284 = vrot.lane.b32.xlu0 %v282_v0, %s1220_s14 }
  0x19   : > { %v255_v5 = vcvt.s32.f32 %v253_v3  ;;  %v257_v6 = vmul.f32 0.00390625, %v254_v4 }
  0x1b   : > { %v258_v7 = vmul.f32 0.00390625, %v255_v5  ;;  %v259_v8 = vfloor.f32 %v257_v6 }
  0x1d   : > { %v260_v9 = vfloor.f32 %v258_v7  ;;  %v261_v10 = vmul.f32 256.0, %v259_v8 }
  0x1f   : > { %v262_v11 = vmul.f32 256.0, %v260_v9  ;;  %v263_v12 = vsub.f32 %v254_v4, %v261_v10 }
  0x21   : > { %v264_v13 = vsub.f32 %v255_v5, %v262_v11  ;;  %v266_v14 = vmul.f32 0.0625, %v263_v12 }
  0x23   : > { %v267_v15 = vmul.f32 0.0625, %v264_v13  ;;  %v1321_v16 = vfloor.f32 %v266_v14 }
  0x25   : > { %v1323_v17 = vfloor.f32 %v267_v15  ;;  %v270_v18 = vmul.f32 16.0, %v1321_v16  ;;  %vm1677_vm6 = vcmp.ge.f32.partialorder %v1321_v16, 1.0  ;;  %vm1669_vm15 = vcmp.le.f32.partialorder %v1321_v16, 14.0 }
  0x27   : > { %v271_v20 = vmul.f32 16.0, %v1323_v17  ;;  %v1328_v23 = vsub.f32 %v263_v12, %v270_v18  ;;  %vm1678_vm8 = vcmp.ge.f32.partialorder %v1323_v17, 1.0  ;;  %vm1672_vm0 = vcmp.le.f32.partialorder %v1323_v17, 14.0 }
  0x29   : > { %v1330_v24 = vsub.f32 %v264_v13, %v271_v20  ;;  %vm1675_vm5 = vcmp.ge.f32.partialorder %v1328_v23, 1.0  ;;  %vm1668_vm12 = vcmp.le.f32.partialorder %v1328_v23, 14.0 }
  0x2a   : > { %vm1340_vm9 = vmand %vm1677_vm6, %vm1675_vm5 }
  0x2b   : > { %vm1679_vm7 = vcmp.ge.f32.partialorder %v1330_v24, 1.0  ;;  %vm1667_vm13 = vcmp.le.f32.partialorder %v1330_v24, 14.0  ;;  %vm1429_vm1 = vmand %vm1669_vm15, %vm1668_vm12 }
  0x2c   : > { %vm1352_vm10 = vmand %vm1678_vm8, %vm1679_vm7 }
  0x8a   : > { %v285_v19 = vpop.permute.xlu0 %284 }
  0x8b   : > { %v286_v21 = vrot.slane %v285_v19, 4 }
  0x8d   : > { %v288_v22 = vsel %vm1666_vm2, %v286_v21, %v285_v19  ;;  %296 = vst.msk [vmem:[#allocation2 + $0x8] sm:$0xf] %vm295_vm3, %v286_v21  ;;  %vm1439_vm3 = vmand %vm1672_vm0, %vm1667_vm13 }
  0x8e   : > { %294 = vst.msk [vmem:[#allocation2] sm:$0xff] %vm293_vm4, %v288_v22  ;;  %vm518_vm4 = vcmask 769024   ;;  %vm1459_vm2 = vmand %vm1672_vm0, %vm1679_vm7 }
  0x94   : > { %v502_v25 = vld [vmem:[#allocation2 + $0x8] sm:$0xf] }
  0x95   : > { %v312_v26 = vld [vmem:[#allocation2 + $0x8] sm:$0xf]  ;;  %516 = vrot.lane.b32.xlu1 %v502_v25, %s1221_s15  ;;  %v1346_v28 = vld [vmem:[#allocation2] sm:$0xff] }
  0x96   : > { %324 = vrot.lane.b32.xlu0 %v312_v26, %s1222_s16  ;;  %v1358_v30 = vcombine.high %v1346_v28, %v1346_v28  ;;  %v307_v31 = vsel %vm1340_vm9, %v1346_v28, 0.0  ;;  %v416_v32 = vld [vmem:[#allocation2 + $0x8] sm:$0xf] }
  0x97   : > { %v368_v33 = vld [vmem:[#allocation2 + $0x8] sm:$0xf]  ;;  %309 = vst [vmem:[#allocation4 + $0x30] sm:$0xf] %v307_v31 }
  0x98   : > { %v308_v34 = vsel %vm1352_vm10, %v1358_v30, 0.0  ;;  %v472_v35 = vld [vmem:[#allocation2 + $0x8] sm:$0xf] }
  0x99   : > { %428 = vrot.lane.b32.xlu1 %v416_v32, %s1223_s17  ;;  %310 = vst [vmem:[#allocation4] sm:$0xf] %v308_v34  ;;  %v446_v36 = vld [vmem:[#allocation2 + $0x8] sm:$0xf] }
  0x9a   : > { %380 = vrot.lane.b32.xlu0 %v368_v33, %s1224_s18  ;;  %v398_v37 = vld [vmem:[#allocation2 + $0x8] sm:$0xf] }
  0x9b   : > { %v342_v38 = vld [vmem:[#allocation2 + $0x8] sm:$0xf] }
  0x9d   : > { %484 = vrot.lane.b32.xlu1 %v472_v35, %s1225_s19 }
  0x9e   : > { %512 = vrot.lane.b32.xlu0 %v1346_v28, %s1221_s15 }
  0xa1   : > { %460 = vrot.lane.b32.xlu1 %v446_v36, %s1226_s20 }
  0xa2   : > { %424 = vrot.lane.b32.xlu0 %v1346_v28, %s1223_s17 }
  0xa5   : > { %406 = vrot.lane.b32.xlu1 %v398_v37, %s1227_s26 }
  0xa6   : > { %456 = vrot.lane.b32.xlu0 %v1346_v28, %s1226_s20 }
  0xa9   : > { %480 = vrot.lane.b32.xlu1 %v1346_v28, %s1225_s19 }
  0xaa   : > { %320 = vrot.lane.b32.xlu0 %v1346_v28, %s1222_s16 }
  0xad   : > { %402 = vrot.lane.b32.xlu1 %v1346_v28, %s1227_s26 }
  0xae   : > { %426 = vrot.lane.b32.xlu0 %v1358_v30, %s1223_s17 }
  0xb1   : > { %376 = vrot.lane.b32.xlu1 %v1346_v28, %s1224_s18 }
  0xb2   : > { %482 = vrot.lane.b32.xlu0 %v1358_v30, %s1225_s19 }
  0xb5   : > { %514 = vrot.lane.b32.xlu1 %v1358_v30, %s1221_s15 }
  0xb6   : > { %458 = vrot.lane.b32.xlu0 %v1358_v30, %s1226_s20 }
  0xb9   : > { %322 = vrot.lane.b32.xlu1 %v1358_v30, %s1222_s16 }
  0xba   : > { %404 = vrot.lane.b32.xlu0 %v1358_v30, %s1227_s26 }
  0xbd   : > { %378 = vrot.lane.b32.xlu1 %v1358_v30, %s1224_s18 }
  0xbe   : > { %354 = vrot.lane.b32.xlu0 %v1358_v30, %s1228_s28 }
  0xc1   : > { %356 = vrot.lane.b32.xlu1 %v342_v38, %s1228_s28 }
  0xc2   : > { %352 = vrot.lane.b32.xlu0 %v1346_v28, %s1228_s28 }
  0xc5   : > { %547 = vperm.xlu1 %1115, %v544_v40  }
 0x107   : > { %v517_v41 = vpop.permute.xlu1 %516 }
 0x108   : > { %v1411_v42 = vpop.permute.xlu0 %324 }
 0x10b   : > { %v429_v43 = vpop.permute.xlu1 %428 }
 0x10c   : > { %v1413_v44 = vpop.permute.xlu0 %380 }
 0x10f   : > { %v485_v45 = vpop.permute.xlu1 %484 }
 0x110   : > { %v513_v46 = vpop.permute.xlu0 %512 }
 0x113   : > { %v461_v47 = vpop.permute.xlu1 %460 }
 0x114   : > { %v425_v48 = vpop.permute.xlu0 %424 }
 0x117   : > { %v407_v49 = vpop.permute.xlu1 %406 }
 0x118   : > { %v457_v50 = vpop.permute.xlu0 %456 }
 0x11b   : > { %v481_v51 = vpop.permute.xlu1 %480 }
 0x11c   : > { %v321_v52 = vpop.permute.xlu0 %320 }
 0x11f   : > { %v403_v53 = vpop.permute.xlu1 %402 }
 0x120   : > { %v427_v54 = vpop.permute.xlu0 %426 }
 0x121   : > { %v431_v55 = vsel %vm1664_vm11, %v425_v48, %v427_v54  ;;  %v432_v56 = vsel %vm1664_vm11, %v427_v54, %v429_v43  ;;  %vm1451_vm11 = vmand %vm1669_vm15, %vm1675_vm5 }
 0x122   : > { %v435_v57 = vsel %vm1668_vm12, %v431_v55, 0.0  ;;  %v436_v58 = vsel %vm1667_vm13, %v432_v56, 0.0  ;;  %vm1671_vm13 = vcmask 908288   ;;  %vm1670_vm12 = vcmask 1039360  }
 0x123   : > { %v439_v59 = vrot.slane %v435_v57, 4  ;;  %v440_v60 = vrot.slane %v436_v58, 4  ;;  %v377_v61 = vpop.permute.xlu1 %376 }
 0x124   : > { %v483_v62 = vpop.permute.xlu0 %482 }
 0x125   : > { %443 = vst [vmem:[#allocation4 + $0x48] sm:$0xf0] %v439_v59  ;;  %444 = vst [vmem:[#allocation4 + $0x28] sm:$0xf0] %v440_v60  ;;  %v487_v0 = vsel %vm1665_vm14, %v481_v51, %v483_v62  ;;  %v488_v1 = vsel %vm1665_vm14, %v483_v62, %v485_v45  ;;  %vm1673_vm14 = vcmask 785408  }
 0x126   : > { %v491_v3 = vsel %vm1669_vm15, %v487_v0, 0.0  ;;  %v492_v4 = vsel %vm1672_vm0, %v488_v1, 0.0  ;;  %vm1674_vm15 = vcmask 916480   ;;  %vm1694_vm0 = vcmp.le.f32.partialorder %v1328_v23, 14.0 }
 0x127   : > { %v495_v6 = vrot.slane %v491_v3, 4  ;;  %v496_v7 = vrot.slane %v492_v4, 4  ;;  %v515_v9 = vpop.permute.xlu1 %514 }
 0x128   : > { %v459_v10 = vpop.permute.xlu0 %458  ;;  %v519_v11 = vsel %vm518_vm4, %v513_v46, %v515_v9  ;;  %v520_v12 = vsel %vm518_vm4, %v515_v9, %v517_v41 }
 0x129   : > { %499 = vst [vmem:[#allocation4 + $0x8] sm:$0xf0] %v495_v6  ;;  %500 = vst [vmem:[#allocation4 + $0x20] sm:$0xf0] %v496_v7  ;;  %v463_v13 = vsel %vm1673_vm14, %v457_v50, %v459_v10  ;;  %v464_v14 = vsel %vm1673_vm14, %v459_v10, %v461_v47  ;;  %v523_v15 = vsel %vm1429_vm1, %v519_v11, 0.0  ;;  %v524_v18 = vsel %vm1439_vm3, %v520_v12, 0.0 }
 0x12a   : > { %v467_v19 = vsel %vm1451_vm11, %v463_v13, 0.0  ;;  %v468_v20 = vsel %vm1459_vm2, %v464_v14, 0.0  ;;  %525 = vst [vmem:[#allocation4 + $0x40] sm:$0xf] %v523_v15  ;;  %526 = vst [vmem:[#allocation4 + $0x38] sm:$0xf] %v524_v18 }
 0x12b   : > { %469 = vst [vmem:[#allocation4 + $0x8] sm:$0xf] %v467_v19  ;;  %470 = vst [vmem:[#allocation4 + $0x20] sm:$0xf] %v468_v20  ;;  %v323_v22 = vpop.permute.xlu1 %322  ;;  %v527_v11 = vld [vmem:[%s1658_s1] sm:$0xf] }
 0x12c   : > { %v405_v21 = vpop.permute.xlu0 %404  ;;  %v327_v31 = vsel %vm1670_vm12, %v321_v52, %v323_v22  ;;  %v328_v32 = vsel %vm1670_vm12, %v323_v22, %v1411_v42  ;;  %vm358_vm12 = vcmask 1031168   ;;  %vm1495_vm14 = vmand %vm1677_vm6, %vm1694_vm0  ;;  %vm614_vm0 = vcmask 1047688  }
 0x12d   : > { %v409_v25 = vsel %vm1671_vm13, %v403_v53, %v405_v21  ;;  %v410_v26 = vsel %vm1671_vm13, %v405_v21, %v407_v49  ;;  %v331_v33 = vsel %vm1677_vm6, %v327_v31, 0.0  ;;  %v332_v34 = vsel %vm1678_vm8, %v328_v32, 0.0 }
 0x12e   : > { %413 = vst [vmem:[#allocation4 + $0x48] sm:$0xf] %v409_v25  ;;  %414 = vst [vmem:[#allocation4 + $0x28] sm:$0xf] %v410_v26  ;;  %v335_v35 = vrot.slane %v331_v33, 4  ;;  %v336_v36 = vrot.slane %v332_v34, 4 }
 0x12f   : > { %v379_v38 = vpop.permute.xlu1 %378  ;;  %vm1676_vm13 = vcmask 1041408  }
 0x130   : > { %v355_v37 = vpop.permute.xlu0 %354  ;;  %339 = vst [vmem:[#allocation4 + $0x30] sm:$0xf0] %v335_v35  ;;  %340 = vst [vmem:[#allocation4] sm:$0xf0] %v336_v36  ;;  %v383_v40 = vsel %vm1674_vm15, %v377_v61, %v379_v38  ;;  %v384_v41 = vsel %vm1674_vm15, %v379_v38, %v1413_v44  ;;  %vm1697_vm15 = vcmp.le.f32.partialorder %v1330_v24, 14.0  ;;  %v817_v35 = vpack.c.bf16 %v1346_v28, %v1346_v28  ;;  %v935_v38 = vld [vmem:[%s1662_s5] sm:$0xff] }
 0x131   : > { %v387_v42 = vsel %vm1675_vm5, %v383_v40, 0.0  ;;  %v388_v43 = vsel %vm1679_vm7, %v384_v41, 0.0  ;;  %v537_v46 = vld [vmem:[#allocation4 + $0x38] sm:$0xf]  ;;  %v536_v47 = vld [vmem:[#allocation4 + $0x40] sm:$0xf]  ;;  %vm1503_vm5 = vmand %vm1678_vm8, %vm1697_vm15  ;;  %v818_v36 = vpack.c.bf16 %v1358_v30, %v1358_v30 }
 0x132   : > { %v391_v48 = vrot.slane %v387_v42, 4  ;;  %v392_v44 = vrot.slane %v388_v43, 4  ;;  %v543_v50 = vpack.c.bf16 %v537_v46, %v537_v46  ;;  %v542_v51 = vpack.c.bf16 %v536_v47, %v536_v47  ;;  %v535_v58 = vld [vmem:[#allocation4 + $0x20] sm:$0xff]  ;;  %v534_v0 = vld [vmem:[#allocation4 + $0x8] sm:$0xff] }
 0x133   : > { %v357_v53 = vpop.permute.xlu1 %356  ;;  %vm550_vm15 = vcmask 293888  }
 0x134   : > { %v353_v52 = vpop.permute.xlu0 %352  ;;  %395 = vst [vmem:[#allocation4 + $0x18] sm:$0xf0] %v391_v48  ;;  %396 = vst [vmem:[#allocation4 + $0x10] sm:$0xf0] %v392_v44  ;;  %v360_v55 = vsel %vm358_vm12, %v355_v37, %v357_v53  ;;  %1028 = vmatprep.subr.msk.bf16.mxu0 %vm1676_vm13, %v543_v50  ;;  %v556_v56 = vsel %vm1676_vm13, %v542_v51, 0 }
 0x135   : > { %v359_v54 = vsel %vm358_vm12, %v353_v52, %v355_v37  ;;  %v533_v57 = vld [vmem:[#allocation4 + $0x28] sm:$0xff]  ;;  %v364_v61 = vsel %vm1503_vm5, %v360_v55, 0.0  ;;  %572 = vmatpush1.bf16.msra.mxu0 %v556_v56  ;;  %v812_v37 = vld [vmem:[#allocation2 + $0x8] sm:$0xf] }
 0x136   : > { %v532_v59 = vld [vmem:[#allocation4 + $0x48] sm:$0xff]  ;;  %v363_v60 = vsel %vm1495_vm14, %v359_v54, 0.0  ;;  %v541_v62 = vpack.c.bf16 %v535_v58, %v533_v57  ;;  %366 = vst [vmem:[#allocation4 + $0x10] sm:$0xf] %v364_v61  ;;  %v819_v40 = vpack.c.bf16 %v812_v37, %v812_v37 }
 0x137   : > { %365 = vst [vmem:[#allocation4 + $0x18] sm:$0xf] %v363_v60  ;;  %v540_v1 = vpack.c.bf16 %v534_v0, %v532_v59  ;;  %v529_v3 = vld [vmem:[#allocation4] sm:$0xff]  ;;  %v528_v6 = vld [vmem:[#allocation4 + $0x30] sm:$0xff] }
 0x138   : > { %573 = vmatprep.subr.bf16.mxu0 %v541_v62 }
 0x139   : > { %574 = vmatpush1.bf16.msra.mxu0 %v540_v1 }
 0x13d   : > { %v531_v4 = vld [vmem:[#allocation4 + $0x10] sm:$0xff] }
 0x13e   : > { %v530_v7 = vld [vmem:[#allocation4 + $0x18] sm:$0xff]  ;;  %v539_v9 = vpack.c.bf16 %v531_v4, %v529_v3 }
 0x13f   : > { %v538_v10 = vpack.c.bf16 %v530_v7, %v528_v6 }
 0x140   : > { %575 = vmatprep.subr.bf16.mxu0 %v539_v9  ;;  %v548_v12 = vpop.permute.xlu1 %547 }
 0x141   : > { %576 = vmatpush1.bf16.msra.mxu0 %v538_v10 }
 0x144   : > { %1029 = vmatmul.mubr.msk.bf16.vlgmr.msra.gmra.mxu0 %vm550_vm15, %v527_v11  ;;  %vm1700_vm15 = vcmask 138240  }
 0x145   : > { %874 = vmatprep.mubr.bf16.mxu0 %v1229_v39  ;;  %vm1701_vm13 = vmmov %vm1700_vm15 }
 0x204   : > { %v595_v13 = vpop.f32.mrf.mxu0 }
 0x205   : > { %v596_v14 = vadd.f32 %v595_v13, %v548_v12 }
 0x206   : > { %v597_v15 = vpop.f32.mrf.mxu0 }
 0x207   : > { %v602_v18 = vmax.f32 %v596_v14, 0.0  ;;  %v598_v19 = vadd.f32 %v597_v15, %v548_v12 }
 0x208   : > { %v599_v20 = vpop.f32.mrf.mxu0 }
 0x209   : > { %v603_v21 = vmax.f32 %v598_v19, 0.0  ;;  %606 = vrot.lane.b32.xlu0 %v602_v18, %s1220_s14 }
 0x20a   : > { %v600_v22 = vpop.f32.mrf.mxu0 }
 0x20b   : > { %608 = vrot.lane.b32.xlu1 %v603_v21, %s1220_s14 }
 0x27b   : > { %v607_v25 = vpop.permute.xlu0 %606 }
 0x27c   : > { %615 = vst.msk [vmem:[#allocation3] sm:$0xff] %vm614_vm0, %v607_v25  ;;  %vm1702_vm0 = vcmask 777216  }
 0x27d   : > { %v609_v26 = vpop.permute.xlu1 %608 }
 0x27e   : > { %v1522_v31 = vsel %vm1700_vm15, %v607_v25, %v609_v26  ;;  %617 = vst.msk [vmem:[#allocation3 + $0x10] sm:$0xff] %vm1701_vm13, %v609_v26  ;;  %vm887_vm13 = vcmask 1043456   ;;  %vm1703_vm15 = vcmask 785408  }
 0x27f   : > { %vm1706_vm8 = vmmov %vm1703_vm15 }
 0x283   : > { %v1525_v39 = vld [vmem:[#allocation3] sm:$0xff] }
 0x284   : > { %748 = vrot.lane.b32.xlu1 %v1525_v39, %s1225_s19  ;;  %728 = vrot.lane.b32.xlu0 %v1525_v39, %s1226_s20  ;;  %v1116_v32 = vpack.i.bf16 %v1522_v31, %v1525_v39 }
 0x285   : > { %v764_v33 = vld [vmem:[#allocation3 + $0x10] sm:$0xff] }
 0x286   : > { %v1126_v34 = vpack.i.bf16 %v764_v33, %v1522_v31 }
 0x288   : > { %708 = vrot.lane.b32.xlu1 %v1525_v39, %s1223_s17  ;;  %690 = vrot.lane.b32.xlu0 %v1525_v39, %s1227_s26 }
 0x28c   : > { %670 = vrot.lane.b32.xlu1 %v1525_v39, %s1224_s18  ;;  %650 = vrot.lane.b32.xlu0 %v1525_v39, %s1228_s28 }
 0x290   : > { %772 = vrot.lane.b32.xlu1 %v764_v33, %s1221_s15  ;;  %1117 = vrot.lane.b32.xlu0 %v1116_v32, %s1221_s15 }
 0x294   : > { %1127 = vrot.lane.b32.xlu1 %v1126_v34, %s1225_s19  ;;  %1122 = vrot.lane.b32.xlu0 %v1126_v34, %s1226_s20  ;;  %s1040_s20 = sshll.u32 %s1288_s25, 8  ;;  %s1231_s25 = smov [#allocation6]  }
 0x295   : > { %s960_s10 = scalar_lea.hbm %s1663_s6, %s1040_s20  ;;  %s1162_s13 = sshll.u32 %s1231_s25, 4  ;;  %s1163_s13 = int_to_ptr.vmem [resolvable:$false] %s1162_s13 }
 0x296   : > { %s1164_s14 = scalar_lea.vmem %s1163_s13, 512 }
 0x298   : > { %1137 = vrot.lane.b32.xlu1 %v1126_v34, %s1223_s17  ;;  %1132 = vrot.lane.b32.xlu0 %v1126_v34, %s1227_s26 }
 0x29c   : > { %1147 = vrot.lane.b32.xlu1 %v1126_v34, %s1224_s18  ;;  %1142 = vrot.lane.b32.xlu0 %v1126_v34, %s1228_s28  ;;  %s242_s18 = sand.u32 1, %s1210_s22  }
 0x29d   : > { %s1025_s19 = sshll.u32 %s242_s18, 4  ;;  %s948_s11 = scalar_lea.sflag [#allocation7], %s242_s18 }
 0x2a0   : > { %630 = vrot.lane.b32.xlu1 %v1525_v39, %s1222_s16  ;;  %823 = vrot.lane.b32.xlu0 %v817_v35, %s1227_s26 }
 0x2a4   : > { %825 = vrot.lane.b32.xlu1 %v818_v36, %s1227_s26  ;;  %1152 = vrot.lane.b32.xlu0 %v1126_v34, %s1222_s16 }
 0x2a8   : > { %938 = vperm.xlu1 %1115, %v935_v38   ;;  %827 = vrot.lane.b32.xlu0 %v819_v40, %s1227_s26  ;;  %s244_s26 = scalar_lea.vmem [#allocation6], %s1025_s19 }
 0x2a9   : > { %s962_s28 = sshll.u32 %s244_s26, 4  ;;  %s963_s28 = int_to_ptr.vmem [resolvable:$true] %s962_s28 }
 0x2aa   : > { %s1158_s12 = scalar_lea.vmem %s963_s28, 256  ;;  %p1165_p0 = scmp.lt.s32.totalorder %s963_s28, %s1163_s13 }
 0x2ab   : > { %p1159_p11 = scmp.ne.s32.totalorder %s963_s28, %s1158_s12  ;;  %p1166_p1 = scmp.lt.s32.totalorder %s1164_s14, %s1158_s12 }
 0x2ad   : > { %p1160_p12 = pnand %p1159_p11, %p1305_p5  ;;  %p1167_p2 = por %p1166_p1, %p1165_p0 }
 0x2af   : > { %p1161_p13 = pneg %p1160_p12 }
 0x2b1   : > { %p1168_p3 = pnand %p1167_p2, %p1161_p13 }
 0x2f6   : > { %v749_v28 = vpop.permute.xlu1 %748  ;;  %v729_v41 = vpop.permute.xlu0 %728 }
 0x2fa   : > { %v709_v42 = vpop.permute.xlu1 %708  ;;  %v691_v43 = vpop.permute.xlu0 %690 }
 0x2fe   : > { %v671_v46 = vpop.permute.xlu1 %670  ;;  %v651_v47 = vpop.permute.xlu0 %650 }
 0x302   : > { %v773_v30 = vpop.permute.xlu1 %772  ;;  %v1118_v48 = vpop.permute.xlu0 %1117 }
 0x303   : > { %v1120_v44 = vunpack.i.h.bf16 %v1118_v48  ;;  %v1119_v50 = vunpack.i.l.bf16 %v1118_v48 }
 0x305   : > { %v775_v51 = vsel %vm518_vm4, %v1120_v44, %v773_v30  ;;  %v774_v52 = vsel %vm518_vm4, %v1119_v50, %v1120_v44  ;;  %vm1704_vm4 = vcmp.le.f32.partialorder %v1323_v17, 14.0 }
 0x306   : > { %v1128_v53 = vpop.permute.xlu1 %1127  ;;  %v1123_v54 = vpop.permute.xlu0 %1122  ;;  %v779_v55 = vsel %vm1439_vm3, %v775_v51, 0.0  ;;  %v778_v56 = vsel %vm1429_vm1, %v774_v52, 0.0  ;;  %vm1041_vm6 = vmpackc.low %vm1704_vm4, %vm1459_vm2  ;;  %vm1707_vm1 = vcmp.le.f32.partialorder %v1321_v16, 14.0 }
 0x307   : > { %v1130_v57 = vunpack.i.h.bf16 %v1128_v53  ;;  %v1129_v58 = vunpack.i.l.bf16 %v1128_v53  ;;  %v1125_v59 = vunpack.i.h.bf16 %v1123_v54  ;;  %v1124_v60 = vunpack.i.l.bf16 %v1123_v54  ;;  %vm1705_vm3 = vmmov %vm1702_vm0 }
 0x308   : > { %v810_v61 = vpack.c.bf16 %v779_v55, %v779_v55  ;;  %v809_v62 = vpack.c.bf16 %v778_v56, %v778_v56  ;;  %vm1044_vm2 = vmpackc.low %vm1707_vm1, %vm1451_vm11  ;;  %vm1714_vm1 = vcmask 916480  }
 0x309   : > { %v755_v0 = vsel %vm1702_vm0, %v1129_v58, %v1130_v57  ;;  %v735_v1 = vsel %vm1703_vm15, %v1124_v60, %v1125_v59  ;;  %v754_v2 = vsel %vm1705_vm3, %v749_v28, %v1129_v58  ;;  %v734_v63 = vsel %vm1706_vm8, %v729_v41, %v1124_v60 }
 0x30a   : > { %v1042_v3 = vpack.c.bf16 %v755_v0, %v735_v1  ;;  %1032 = vmatprep.subr.msk.bf16.mxu1 %vm887_vm13, %v810_v61  ;;  %v889_v4 = vsel %vm887_vm13, %v809_v62, 0  ;;  %v1138_v6 = vpop.permute.xlu1 %1137  ;;  %v1133_v7 = vpop.permute.xlu0 %1132  ;;  %v1045_v8 = vpack.c.bf16 %v754_v2, %v734_v63  ;;  %vm1708_vm0 = vcmask 900096  }
 0x30b   : > { %901 = vmatpush1.bf16.msra.mxu1 %v889_v4  ;;  %v1140_v9 = vunpack.i.h.bf16 %v1138_v6  ;;  %v1139_v10 = vunpack.i.l.bf16 %v1138_v6  ;;  %v1135_v11 = vunpack.i.h.bf16 %v1133_v7  ;;  %v1134_v12 = vunpack.i.l.bf16 %v1133_v7  ;;  %vm1711_vm3 = vmmov %vm1708_vm0 }
 0x30c   : > { %1043 = vmatprep.subr.msk.bf16.mxu1 %vm1041_vm6, %v1042_v3  ;;  %vm1709_vm8 = vcmask 908288   ;;  %vm1230_vm15 = vmmov 1   ;;  %vm1710_vm13 = vcmp.le.f32.partialorder %v1330_v24, 14.0  ;;  %vm1713_vm6 = vcmp.le.f32.partialorder %v1328_v23, 14.0 }
 0x30d   : > { %v715_v13 = vsel %vm1708_vm0, %v1139_v10, %v1140_v9  ;;  %v697_v14 = vsel %vm1709_vm8, %v1134_v12, %v1135_v11  ;;  %vm1047_vm4 = vmpackc.low %vm1710_vm13, %vm1230_vm15  ;;  %v714_v15 = vsel %vm1711_vm3, %v709_v42, %v1139_v10  ;;  %vm1719_vm13 = vcmask 1039360  }
 0x30e   : > { %vm1712_vm7 = vmmov %vm1709_vm8  ;;  %v1048_v19 = vpack.c.bf16 %v715_v13, %v697_v14  ;;  %v1148_v20 = vpop.permute.xlu1 %1147  ;;  %v1143_v21 = vpop.permute.xlu0 %1142 }
 0x30f   : > { %v696_v18 = vsel %vm1712_vm7, %v691_v43, %v1134_v12  ;;  %1046 = vmatpush1.bf16.msk.msra.mxu1 %vm1044_vm2, %v1045_v8  ;;  %v1150_v5 = vunpack.i.h.bf16 %v1148_v20  ;;  %v1149_v22 = vunpack.i.l.bf16 %v1148_v20  ;;  %v1145_v25 = vunpack.i.h.bf16 %v1143_v21  ;;  %vm1050_vm11 = vmpackc.low %vm1713_vm6, %vm1230_vm15 }
 0x310   : > { %v1144_v26 = vunpack.i.l.bf16 %v1143_v21  ;;  %1049 = vmatprep.subr.msk.bf16.mxu1 %vm1047_vm4, %v1048_v19  ;;  %v1051_v32 = vpack.c.bf16 %v714_v15, %v696_v18  ;;  %vm1715_vm7 = vcmp.ge.f32.partialorder %v1330_v24, 1.0  ;;  %vm1716_vm8 = vmmov %vm1714_vm1  ;;  %vm1717_vm2 = vcmp.ge.f32.partialorder %v1328_v23, 1.0 }
 0x311   : > { %v677_v33 = vsel %vm1714_vm1, %v1149_v22, %v1150_v5  ;;  %vm1053_vm0 = vmpackc.low %vm1715_vm7, %vm1503_vm5  ;;  %v676_v35 = vsel %vm1716_vm8, %v671_v46, %v1149_v22  ;;  %vm1718_vm5 = vcmask 908288   ;;  %vm1721_vm4 = vcmp.ge.f32.partialorder %v1323_v17, 1.0  ;;  %v813_v17 = vld [vmem:[%s1661_s4] sm:$0xf] }
 0x312   : > { %v657_v34 = vsel %vm358_vm12, %v1144_v26, %v1145_v25  ;;  %v656_v36 = vsel %vm358_vm12, %v651_v47, %v1144_v26  ;;  %v631_v38 = vpop.permute.xlu1 %630  ;;  %v824_v40 = vpop.permute.xlu0 %823  ;;  %vm1056_vm15 = vmpackc.low %vm1717_vm2, %vm1495_vm14  ;;  %vm1722_vm14 = vcmp.ge.f32.partialorder %v1321_v16, 1.0  ;;  %vm1724_vm1 = vcmask 1041408  }
 0x313   : > { %v1054_v37 = vpack.c.bf16 %v677_v33, %v657_v34  ;;  %1052 = vmatpush1.bf16.msk.msra.mxu1 %vm1050_vm11, %v1051_v32  ;;  %v1057_v28 = vpack.c.bf16 %v676_v35, %v656_v36  ;;  %vm1720_vm12 = vmmov %vm1719_vm13 }
 0x314   : > { %vm1059_vm3 = vmpackc.low %vm1721_vm4, %vm1352_vm10  ;;  %vm832_vm10 = vcmask 31744  }
 0x315   : > { %1055 = vmatprep.subr.msk.bf16.mxu1 %vm1053_vm0, %v1054_v37  ;;  %vm1062_vm6 = vmpackc.low %vm1722_vm14, %vm1340_vm9  ;;  %vm883_vm9 = vcmask 588800  }
 0x316   : > { %v826_v41 = vpop.permute.xlu1 %825  ;;  %v1153_v49 = vpop.permute.xlu0 %1152  ;;  %vm1723_vm11 = vmmov %vm1718_vm5 }
 0x317   : > { %1058 = vmatpush1.bf16.msk.msra.mxu1 %vm1056_vm15, %v1057_v28  ;;  %v1155_v24 = vunpack.i.h.bf16 %v1153_v49  ;;  %v1154_v42 = vunpack.i.l.bf16 %v1153_v49  ;;  %v830_v43 = vsel %vm1718_vm5, %v824_v40, %v826_v41  ;;  %vm1725_vm7 = vmmov %vm1724_vm1 }
 0x318   : > { %v837_v44 = vsel %vm1724_vm1, %v830_v43, 0 }
 0x319   : > { %v636_v46 = vsel %vm1719_vm13, %v631_v38, %v1154_v42  ;;  %v637_v47 = vsel %vm1720_vm12, %v1154_v42, %v1155_v24 }
 0x31a   : > { %v1060_v23 = vpack.c.bf16 %v637_v47, %v1522_v31  ;;  %v1063_v45 = vpack.c.bf16 %v636_v46, %v1525_v39  ;;  %v828_v30 = vpop.permute.xlu0 %827 }
 0x31b   : > { %v831_v48 = vsel %vm1723_vm11, %v826_v41, %v828_v30 }
 0x31c   : > { %1030 = vmatprep.subr.msk.bf16.mxu0 %vm1725_vm7, %v831_v48  ;;  %1061 = vmatprep.subr.msk.bf16.mxu1 %vm1059_vm3, %v1060_v23 }
 0x31d   : > { %857 = vmatpush1.bf16.msra.mxu0 %v837_v44  ;;  %1064 = vmatpush1.bf16.msk.msra.mxu1 %vm1062_vm6, %v1063_v45 }
 0x320   : > { %1031 = vmatmul.mubr.msk.bf16.vlgmr.msra.gmra.mxu0 %vm832_vm10, %v813_v17  ;;  %1033 = vmatmul.mubr.msk.bf16.vlgmr.msra.gmra.mxu1 %vm883_vm9, %v782_v27 }
 0x323   : > { %v939_v31 = vpop.permute.xlu1 %938 }
 0x3e0   : > { %v876_v16 = vpop.f32.mrf.mxu0  ;;  %v928_v29 = vpop.f32.mrf.mxu1 }
 0x3e1   : > { %v929_v39 = vadd.f32 %v928_v29, %v876_v16 }
 0x3e2   : > { %v878_v50 = vpop.f32.mrf.mxu0  ;;  %v930_v51 = vpop.f32.mrf.mxu1 }
 0x3e3   : > { %v941_v52 = vadd.f32 %v939_v31, %v929_v39  ;;  %v931_v53 = vadd.f32 %v930_v51, %v878_v50 }
 0x3e4   : > { %v880_v54 = vpop.f32.mrf.mxu0  ;;  %v932_v55 = vpop.f32.mrf.mxu1 }
 0x3e5   : > { %v943_v56 = vmax.f32 %v941_v52, 0.0  ;;  %v942_v57 = vadd.f32 %v939_v31, %v931_v53 }
 0x3e6   : > { %v881_v58 = vpop.f32.mrf.mxu0  ;;  %v933_v59 = vpop.f32.mrf.mxu1 }
 0x3e7   : > { %945 = vst [vmem:[%s244_s26] sm:$0xff] %v943_v56  ;;  %v944_v60 = vmax.f32 %v942_v57, 0.0 }
 0x3e9   : > { %946 = vst [vmem:[%s244_s26 + $0x8] sm:$0xff] %v944_v60 }
 0x3ea   : > { %1171 = shalt.err (!%p1168_p3)
}
 0x3eb   : > { %s1172_s15 = scalar_lea.hbm %s960_s10, 256  ;;  %s1176_s18 = scalar_lea.hbm %s1663_s6, 512 }
 0x3ec   : > { %p1173_p4 = scmp.ne.s32.totalorder %s960_s10, %s1172_s15  ;;  %p1177_p9 = scmp.lt.s32.totalorder %s960_s10, %s1663_s6 }
 0x3ed   : > { %p1178_p10 = scmp.lt.s32.totalorder %s1176_s18, %s1172_s15 }
 0x3ee   : > { %p1174_p7 = pnand %p1173_p4, %p1305_p5 }
 0x3ef   : > { %p1179_p11 = por %p1178_p10, %p1177_p9 }
 0x3f0   : > { %p1175_p8 = pneg %p1174_p7 }
 0x3f2   : > { %p1180_p12 = pnand %p1179_p11, %p1175_p8 }
 0x3f4   : > { %1183 = shalt.err (!%p1180_p12)
}
 0x3f5   : > { %1065 = dma.vmem_to_hbm [thread:$0]  (%p1305_p5), %s963_s28, 256, %s960_s10, %s948_s11  }
 0x3f6 PF: > { %p1071_p13 = scmp.ge.s32.totalorder %s1218_s24, 2  ;;  %s974_s26 = sand.u32 1, %s1206_s21  }
 0x3f7   : > { %s975_s29 = scalar_lea.sflag [#allocation7], %s974_s26 }
 0x3f8   : > { %p1068_p0 = pnand %p1071_p13, %p1309_p6 }
 0x3fa   : > { %p1069_p1 = pneg %p1068_p0 }
 0x3fc   : > { %1201 = dma.done.wait (%p1069_p1), %s975_s29, 256  }
 0x3fd   : > { %1203 = vsyncadd (%p1069_p1), %s975_s29, 4294967040  ;;  %p16_p2 = scmp.ge.s32.totalorder %s1292_s27, 4   ;;  %s1726_s21 = smov %s1210_s22 }
 0x3fe   : > { %s1727_s22 = smov %s1214_s23  ;;  %s1728_s23 = smov %s1303_s30 }
 0x3ff   : > { %s1729_s24 = smov %s1292_s27  ;;  %18 = sbr.rel (!%p16_p2) target bundleno = 3 (0x3), region = 79 }
 0x404   :  { %980 = vsyncpa [#allocation7], 1 }
 0x405   :  { %982 = vsyncpa [#allocation7 + $0x1], 1 }

</bundles_post_ra>
